<compile_context>
chip_gen: v7x
topology: tpu7x:2x2x1
jax: 0.10.0
libtpu: 0.0.40
codegen_flags: <defaults>
</compile_context>

<pallas_src>
import jax
import jax.numpy as jnp
from jax.experimental import pallas as pl
from jax.experimental.pallas import tpu as pltpu

EPS = 1e-5


def bn2d_kernel(params_ref, x_ref, o_ref):
    # params_ref: (C, 4) columns = [running_mean, running_var, weight, bias]
    # x_ref, o_ref: (C, block_m) lane-dense tiles.
    mean = params_ref[:, 0:1]                      # (C, 1)
    var = params_ref[:, 1:2]                       # (C, 1)
    w = params_ref[:, 2:3]                         # (C, 1)
    b = params_ref[:, 3:4]                         # (C, 1)

    # Fused affine computed once per tile on the tiny per-channel slice.
    scale = w * jax.lax.rsqrt(var + EPS)           # (C, 1)
    shift = b - mean * scale                       # (C, 1)

    # 2 VPU ops per element of x: mul + add (broadcast along lanes).
    o_ref[...] = x_ref[...] * scale + shift


def batchnorm2d(x, running_mean, running_var, weight, bias, *, block_m=512):
    n, c, h, w = x.shape
    m = n * h * w

    # Layout plumbing in the wrapper: (N, C, H, W) -> (C, N*H*W).
    x2 = jnp.transpose(x, (1, 0, 2, 3)).reshape(c, m)
    params = jnp.stack(
        [running_mean, running_var, weight, bias], axis=1
    ).astype(x.dtype)                              # (C, 4)

    # Lane-dense block over the long axis: multiple of 128, capped at block_m.
    bm = min(block_m, pl.cdiv(m, 128) * 128)
    grid = (pl.cdiv(m, bm),)

    out2 = pl.pallas_call(
        bn2d_kernel,
        out_shape=jax.ShapeDtypeStruct((c, m), x.dtype),
        grid_spec=pltpu.PrefetchScalarGridSpec(
            num_scalar_prefetch=0,
            grid=grid,
            in_specs=[
                # Params: same tiny tile at every grid step (kept resident).
                pl.BlockSpec((c, 4), lambda i: (0, 0)),
                # x: lane-dense strips along the folded N*H*W axis.
                pl.BlockSpec((c, bm), lambda i: (0, i)),
            ],
            out_specs=pl.BlockSpec((c, bm), lambda i: (0, i)),
        ),
        compiler_params=pltpu.CompilerParams(
            dimension_semantics=("parallel",),
        ),
    )(params, x2)

    # Back to the module's NCHW layout.
    return jnp.transpose(out2.reshape(c, n, h, w), (1, 0, 2, 3))


if __name__ == "__main__":
    # Deterministic parameters from the module's __init__ (C = 2).
    running_mean = jnp.array([0.5, 0.4], dtype=jnp.float32)
    running_var = jnp.array([3.0, 2.0], dtype=jnp.float32)
    weight = jnp.array([3.0, 2.0], dtype=jnp.float32)
    bias = jnp.array([0.5, 0.4], dtype=jnp.float32)

    # Input shape annotated in the module: (10, 2, 3, 3) float32.
    key = jax.random.PRNGKey(0)
    x = jax.random.normal(key, (10, 2, 3, 3), dtype=jnp.float32)

    out = batchnorm2d(x, running_mean, running_var, weight, bias)
    out = jax.block_until_ready(out)

    # Reference check (plain JAX, eval-mode batchnorm semantics).
    ref = (x - running_mean[None, :, None, None]) / jnp.sqrt(
        running_var[None, :, None, None] + EPS
    ) * weight[None, :, None, None] + bias[None, :, None, None]
    assert out.shape == x.shape
    assert jnp.allclose(out, ref, atol=1e-5, rtol=1e-5), "mismatch vs reference"

    print("KERNEL_OK")
</pallas_src>

<mosaic_0001>
module attributes {stable_mosaic.version = 11 : i64} {
  func.func @bn2d_kernel(%arg0: i32, %arg1: memref<2x4xf32, #tpu.memory_space<vmem>>, %arg2: memref<2x128xf32, #tpu.memory_space<vmem>>, %arg3: memref<2x128xf32, #tpu.memory_space<vmem>>) attributes {dimension_semantics = [#tpu.dimension_semantics<parallel>], iteration_bounds = array<i64: 1>, scalar_prefetch = 0 : i64, scratch_operands = 0 : i64, tpu.core_type = #tpu.core_type<tc>, window_params = [{pipeline_mode = #tpu.pipeline_mode<synchronous>, transform_indices = @transform_0, window_bounds = array<i64: 2, 4>}, {transform_indices = @transform_1, window_bounds = array<i64: 2, 128>}, {transform_indices = @transform_2, window_bounds = array<i64: 2, 128>}]} {
    %c0 = arith.constant 0 : index
    %c0_0 = arith.constant 0 : index
    %0 = vector.load %arg1[%c0, %c0_0] : memref<2x4xf32, #tpu.memory_space<vmem>>, vector<2x1xf32>
    %c0_1 = arith.constant 0 : index
    %c1 = arith.constant 1 : index
    %1 = vector.load %arg1[%c0_1, %c1] : memref<2x4xf32, #tpu.memory_space<vmem>>, vector<2x1xf32>
    %c0_2 = arith.constant 0 : index
    %c2 = arith.constant 2 : index
    %2 = vector.load %arg1[%c0_2, %c2] : memref<2x4xf32, #tpu.memory_space<vmem>>, vector<2x1xf32>
    %c0_3 = arith.constant 0 : index
    %c3 = arith.constant 3 : index
    %3 = vector.load %arg1[%c0_3, %c3] : memref<2x4xf32, #tpu.memory_space<vmem>>, vector<2x1xf32>
    %cst = arith.constant 9.99999974E-6 : f32
    %4 = vector.broadcast %cst : f32 to vector<2x1xf32>
    %5 = arith.addf %1, %4 : vector<2x1xf32>
    %6 = math.rsqrt %5 : vector<2x1xf32>
    %7 = arith.mulf %2, %6 : vector<2x1xf32>
    %8 = arith.mulf %0, %7 : vector<2x1xf32>
    %9 = arith.subf %3, %8 : vector<2x1xf32>
    %c0_4 = arith.constant 0 : index
    %c0_5 = arith.constant 0 : index
    %10 = vector.load %arg2[%c0_4, %c0_5] : memref<2x128xf32, #tpu.memory_space<vmem>>, vector<2x128xf32>
    %11 = vector.broadcast %7 : vector<2x1xf32> to vector<2x128xf32>
    %12 = arith.mulf %10, %11 : vector<2x128xf32>
    %13 = vector.broadcast %9 : vector<2x1xf32> to vector<2x128xf32>
    %14 = arith.addf %12, %13 : vector<2x128xf32>
    %c0_6 = arith.constant 0 : index
    %c0_7 = arith.constant 0 : index
    %15 = vector.load %arg3[%c0_6, %c0_7] : memref<2x128xf32, #tpu.memory_space<vmem>>, vector<2x128xf32>
    tpu.vector_store %arg3[%c0_6, %c0_7], %14 {strides = array<i32>} : memref<2x128xf32, #tpu.memory_space<vmem>>, vector<2x128xf32>,
    return
  }
  func.func @transform_0(%arg0: i32) -> (i32, i32) {
    %c0_i32 = arith.constant 0 : i32
    %c0_i32_0 = arith.constant 0 : i32
    %c0_i32_1 = arith.constant 0 : i32
    return %c0_i32, %c0_i32_0 : i32, i32
  }
  func.func @transform_1(%arg0: i32) -> (i32, i32) {
    %c0_i32 = arith.constant 0 : i32
    %c0_i32_0 = arith.constant 0 : i32
    return %c0_i32, %arg0 : i32, i32
  }
  func.func @transform_2(%arg0: i32) -> (i32, i32) {
    %c0_i32 = arith.constant 0 : i32
    %c0_i32_0 = arith.constant 0 : i32
    return %c0_i32, %arg0 : i32, i32
  }
}

</mosaic_0001>

<bundles_post_ra>
// kernel: tpu_custom_call.1
= control target key start
LH: loop header
LB: loop body
LE: loop exit
PB: predicated region body
PF: predicated region fallthrough
CT: control target
= control target key end

     0   :  { %7 = vsyncpa [#allocation3], 0  ;;  %s178_s0 = inlined_call_operand.hbm [shape: f32[2,4], index: 0, kind: input, shape index: {}]   ;;  %s179_s1 = inlined_call_operand.vmem [shape: f32[2,90], index: 1, kind: input, shape index: {}]   ;;  %s180_s2 = inlined_call_operand.hbm [shape: f32[2,90], index: 2, kind: output, shape index: {}]  }
   0x1   :  { %8 = vsyncpa [#allocation4], 0  ;;  %s129_s9 = smov [#allocation2]   ;;  %s81_s13 = scalar_lea.hbm %s178_s0, 32 }
   0x2   :  { %s15_s10 = sshll.u32 %s129_s9, 4  ;;  %p82_p0 = scmp.ne.s32.totalorder %s178_s0, %s81_s13  ;;  %s16_s10 = int_to_ptr.vmem [resolvable:$true] %s15_s10 }
   0x3   :  { %p85_p1 = scmp.lt.u32.totalorder %s81_s13, %s178_s0 }
   0x5   :  { %p87_p2 = pnand %p85_p1, %p82_p0 }
   0x7   :  { %90 = shalt.err (!%p87_p2)
}
   0x8   :  { %s91_s18 = scalar_lea.vmem %s16_s10, 32  ;;  %p96_p4 = scmp.lt.s32.totalorder %s16_s10, %s16_s10 }
   0x9   :  { %p92_p3 = scmp.ne.s32.totalorder %s16_s10, %s91_s18  ;;  %p97_p5 = scmp.lt.s32.totalorder %s91_s18, %s91_s18 }
   0xb   :  { %p98_p6 = por %p97_p5, %p96_p4 }
   0xd   :  { %p99_p7 = pnand %p98_p6, %p92_p3 }
   0xf   :  { %102 = shalt.err (!%p99_p7)
}
  0x10   :  { %18 = dma.hbm_to_vmem [thread:$0]  %s178_s0, 32, %s16_s10, [#allocation3]  }
  0x11   :  { %125 = dma.done.wait [#allocation3], 32  }
  0x12   :  { %126 = vsyncadd [#allocation3], 4294967264  ;;  %v24_v0 = vld [vmem:[#allocation2] sm:$0x3]  ;;  %s130_s21 = smov 1   ;;  %v131_v3 = vmov 2  }
  0x13   :  { %v25_v1 = vadd.f32 1e-05, %v24_v0  ;;  %77 = vset.pattern.permute.xlu1 %v131_v3  ;;  %s132_s22 = smov 126   ;;  %v133_v6 = vmov 3   ;;  %s134_s23 = smov 3  }
  0x14   :  { %78 = vset.pattern.permute.xlu0 %v133_v6  ;;  %v42_v11 = vld [vmem:[%s179_s1] sm:$0x3]  ;;  %s135_s25 = smov [#allocation5]  }
  0x15   :  { %79 = vrsqrt.f32 %v25_v1  ;;  %s61_s26 = sshll.u32 %s135_s25, 4  ;;  %s62_s26 = int_to_ptr.vmem [resolvable:$true] %s61_s26 }
  0x16   :  { %s103_s27 = scalar_lea.vmem %s62_s26, 32  ;;  %p108_p9 = scmp.lt.s32.totalorder %s62_s26, %s62_s26 }
  0x17   :  { %p104_p8 = scmp.ne.s32.totalorder %s62_s26, %s103_s27  ;;  %p109_p10 = scmp.lt.s32.totalorder %s103_s27, %s103_s27 }
  0x19   :  { %p110_p11 = por %p109_p10, %p108_p9 }
  0x1b   :  { %p111_p12 = pnand %p110_p11, %p104_p8 }
  0x1f   :  { %v80_v2 = vpop.eup %79 }
  0x20   :  { %28 = vrot.lane.b32.xlu0 %v80_v2, %s130_s21 }
  0x92   :  { %v29_v4 = vpop.permute.xlu0 %28 }
  0x93   :  { %v31_v5 = vmul.f32 %v29_v4, %v24_v0 }
  0x95   :  { %33 = vrot.lane.b32.xlu0 %v31_v5, %s132_s22 }
 0x107   :  { %v34_v7 = vpop.permute.xlu0 %33 }
 0x108   :  { %v36_v8 = vmul.f32 %v34_v7, %v24_v0 }
 0x10a   :  { %38 = vrot.lane.b32.xlu1 %v36_v8, %s134_s23 }
 0x10e   :  { %44 = vperm.xlu1 %77, %v31_v5  }
 0x17c   :  { %v39_v9 = vpop.permute.xlu1 %38 }
 0x17d   :  { %v41_v10 = vsub.f32 %v24_v0, %v39_v9 }
 0x17f   :  { %50 = vperm.xlu0 %78, %v41_v10  }
 0x18d   :  { %v45_v12 = vpop.permute.xlu1 %44 }
 0x18e   :  { %v47_v13 = vmul.f32 %v45_v12, %v42_v11 }
 0x1fe   :  { %v51_v14 = vpop.permute.xlu0 %50 }
 0x1ff   :  { %v53_v15 = vadd.f32 %v51_v14, %v47_v13 }
 0x201   :  { %54 = vst [vmem:[#allocation5] sm:$0x3] %v53_v15 }
 0x202   :  { %114 = shalt.err (!%p111_p12)
}
 0x203   :  { %s115_s30 = scalar_lea.hbm %s180_s2, 32 }
 0x204   :  { %p116_p13 = scmp.ne.s32.totalorder %s180_s2, %s115_s30  ;;  %p119_p0 = scmp.lt.u32.totalorder %s115_s30, %s180_s2 }
 0x206   :  { %p121_p1 = pnand %p119_p0, %p116_p13 }
 0x208   :  { %124 = shalt.err (!%p121_p1)
}
 0x209   :  { %64 = dma.vmem_to_hbm [thread:$0]  %s62_s26, 32, %s180_s2, [#allocation4]  }
 0x20a   :  { %127 = dma.done.wait [#allocation4], 32  }
 0x20b   :  { %128 = vsyncadd [#allocation4], 4294967264 }
 0x20c   :  { %68 = vsyncpa [#allocation3], 1 }
 0x20d   :  { %69 = vsyncpa [#allocation4], 1 }

</bundles_post_ra>
